<compile_context>
chip_gen: v7x
topology: tpu7x:2x2x1
jax: 0.10.0
libtpu: 0.0.40
codegen_flags: <defaults>
</compile_context>

<pallas_src>
import numpy as np

import jax
import jax.numpy as jnp
from jax.experimental import pallas as pl
from jax.experimental.pallas import tpu as pltpu


# ---------------------------------------------------------------------------
# In-kernel stand-in "model": per-pixel MLP conditioned on (t, y) embedding.
# Layer 1 (contraction over C, tiny) on the VPU in f32; layer 2 on the MXU in bf16.
# ---------------------------------------------------------------------------

def _layer1_vpu_f32(w1t, xt):
    # w1t: (D, C) f32 ; xt: (C, HW) f32 -> (D, HW) f32
    # C is tiny (e.g. 4): do C broadcast-FMAs on the VPU instead of a 256-wide MXU pass.
    D, C = w1t.shape
    acc = w1t[:, 0:1] * xt[0:1, :]
    for c in range(1, C):
        acc = acc + w1t[:, c:c + 1] * xt[c:c + 1, :]
    return acc


# ---------------------------------------------------------------------------
# Fused kernels (q_sample -> model(cond) [-> model(balanced)] -> losses)
# x_t / h / h_bal never leave VMEM; only loss / second are written to HBM.
# ---------------------------------------------------------------------------

def _fused_cb_kernel(x0_ref, noise_ref, ca_ref, cb_ref, w_ref,
                     emb_c_ref, emb_b_ref, w1t_ref, w2t_ref,
                     loss_ref, second_ref):
    TB, C, HW = x0_ref.shape
    w1t = w1t_ref[...]            # (D, C) f32, VMEM-resident for the whole grid
    w2t = w2t_ref[...]            # (C, D) bf16, VMEM-resident for the whole grid

    def per_elem(b, carry):
        x0 = x0_ref[b]            # (C, HW) f32
        nz = noise_ref[b]         # (C, HW) f32
        # q_sample: x_t = sqrt(alpha_bar)*x_0 + sqrt(1-alpha_bar)*noise   (f32, stays in vregs)
        xt = ca_ref[b] * x0 + cb_ref[b] * nz

        # Shared first layer, hoisted out of the two model passes.
        h1 = _layer1_vpu_f32(w1t, xt)                                    # (D, HW) f32
        a_c = jnp.maximum(h1 + emb_c_ref[b], 0.0).astype(jnp.bfloat16)   # (D, HW)
        a_b = jnp.maximum(h1 + emb_b_ref[b], 0.0).astype(jnp.bfloat16)   # (D, HW)

        # Single MXU pass for both heads: N = 2*HW (lane-aligned concat, HW % 128 == 0).
        a_both = jnp.concatenate([a_c, a_b], axis=-1)                    # (D, 2*HW) bf16
        h_both = jnp.dot(w2t, a_both, preferred_element_type=jnp.float32)  # (C, 2*HW) f32
        h = h_both[:, :HW]
        h_bal = h_both[:, HW:]

        d = h - nz
        loss_ref[b] = d * d                    # F.mse_loss(h, noise, reduction='none')
        db = h - h_bal
        # Forward value of loss_reg + 1/4*loss_com == 1.25 * weight * (h - h_bal)^2
        second_ref[b] = (1.25 * w_ref[b]) * (db * db)
        return carry

    jax.lax.fori_loop(0, TB, per_elem, 0, unroll=(TB <= 8))


def _fused_mse_kernel(x0_ref, noise_ref, ca_ref, cb_ref, emb_c_ref,
                      w1t_ref, w2t_ref, loss_ref):
    TB, C, HW = x0_ref.shape
    w1t = w1t_ref[...]
    w2t = w2t_ref[...]

    def per_elem(b, carry):
        x0 = x0_ref[b]
        nz = noise_ref[b]
        xt = ca_ref[b] * x0 + cb_ref[b] * nz
        h1 = _layer1_vpu_f32(w1t, xt)
        a = jnp.maximum(h1 + emb_c_ref[b], 0.0).astype(jnp.bfloat16)
        h = jnp.dot(w2t, a, preferred_element_type=jnp.float32)
        d = h - nz
        loss_ref[b] = d * d
        return carry

    jax.lax.fori_loop(0, TB, per_elem, 0, unroll=(TB <= 8))


# ---------------------------------------------------------------------------
# Wrappers
# ---------------------------------------------------------------------------

_VMEM_LIMIT_BYTES = 32 * 1024 * 1024   # explicit; >= v5e default (16 MiB), safe on v7x (64 MiB phys)
_BLOCK_BUDGET_BYTES = 12 * 1024 * 1024  # double-buffered block working-set budget (leaves headroom)


def _pick_tb(B, C, HW, D, n_big):
    """Largest batch-tile that (a) fits the VMEM budget with double buffering,
    (b) keeps >= 2 grid steps when B allows (v7x megacore), (c) divides B."""
    per_elem = (n_big * C * HW + 2 * D + 3) * 4   # f32 bytes per batch element per step
    per_elem *= 2                                 # pipeline double-buffering
    tb = max(1, min(B, _BLOCK_BUDGET_BYTES // max(per_elem, 1)))
    if B >= 2:
        tb = min(tb, pl.cdiv(B, 2))
    while B % tb:
        tb -= 1
    return int(tb)


def fused_cb_forward(x0, noise, coef_a, coef_b, wvec, emb_c, emb_b, w1t, w2t):
    """x0/noise: (B, C, HW) f32; coef_a/coef_b/wvec: (B, 1, 1) f32;
    emb_c/emb_b: (B, D, 1) f32; w1t: (D, C) f32; w2t: (C, D) bf16."""
    B, C, HW = x0.shape
    D = w1t.shape[0]
    TB = _pick_tb(B, C, HW, D, n_big=4)  # x0, noise, loss, second
    act = pl.BlockSpec((TB, C, HW), lambda b: (b, 0, 0))
    coef = pl.BlockSpec((TB, 1, 1), lambda b: (b, 0, 0))
    emb = pl.BlockSpec((TB, D, 1), lambda b: (b, 0, 0))
    wspec = pl.BlockSpec(memory_space=pltpu.MemorySpace.VMEM)  # whole weight, resident once
    return pl.pallas_call(
        _fused_cb_kernel,
        grid=(B // TB,),
        in_specs=[act, act, coef, coef, coef, emb, emb, wspec, wspec],
        out_specs=(act, act),
        out_shape=(jax.ShapeDtypeStruct((B, C, HW), jnp.float32),
                   jax.ShapeDtypeStruct((B, C, HW), jnp.float32)),
        compiler_params=pltpu.CompilerParams(
            dimension_semantics=("parallel",),
            vmem_limit_bytes=_VMEM_LIMIT_BYTES),
    )(x0, noise, coef_a, coef_b, wvec, emb_c, emb_b, w1t, w2t)


def fused_mse_forward(x0, noise, coef_a, coef_b, emb_c, w1t, w2t):
    B, C, HW = x0.shape
    D = w1t.shape[0]
    TB = _pick_tb(B, C, HW, D, n_big=3)  # x0, noise, loss
    act = pl.BlockSpec((TB, C, HW), lambda b: (b, 0, 0))
    coef = pl.BlockSpec((TB, 1, 1), lambda b: (b, 0, 0))
    emb = pl.BlockSpec((TB, D, 1), lambda b: (b, 0, 0))
    wspec = pl.BlockSpec(memory_space=pltpu.MemorySpace.VMEM)
    return pl.pallas_call(
        _fused_mse_kernel,
        grid=(B // TB,),
        in_specs=[act, act, coef, coef, emb, wspec, wspec],
        out_specs=act,
        out_shape=jax.ShapeDtypeStruct((B, C, HW), jnp.float32),
        compiler_params=pltpu.CompilerParams(
            dimension_semantics=("parallel",),
            vmem_limit_bytes=_VMEM_LIMIT_BYTES),
    )(x0, noise, coef_a, coef_b, emb_c, w1t, w2t)


# ---------------------------------------------------------------------------
# Trainer (mirrors GaussianDiffusionTrainer, temperature_beta=False, edm2_truncate=False)
# Fully traceable: no host-side RNG branch (label drop is a traced jnp.where).
# ---------------------------------------------------------------------------

class GaussianDiffusionTrainer:
    def __init__(self, param_key, beta_1, beta_T, T, num_class, cfg, cb, tau,
                 weight, finetune, in_channels, hidden):
        self.T = T
        self.num_class = num_class
        self.cfg = cfg
        self.cb = cb
        self.tau = tau
        self.weight = weight
        self.finetune = finetune
        self.in_channels = in_channels
        self.hidden = hidden

        # Schedule built in float64 (torch uses .double() buffers); stored f32 since
        # extract() casts to float at gather time anyway.
        betas64 = np.linspace(float(beta_1), float(beta_T), T, dtype=np.float64)
        alphas_bar = np.cumprod(1.0 - betas64)
        self.betas = jnp.asarray(betas64, dtype=jnp.float32)
        self.sqrt_alphas_bar = jnp.asarray(np.sqrt(alphas_bar), dtype=jnp.float32)
        self.sqrt_one_minus_alphas_bar = jnp.asarray(np.sqrt(1.0 - alphas_bar),
                                                     dtype=jnp.float32)

        # Deterministic synthetic "model" parameters (stand-in for the UNet argument).
        k1, k2, k3, k4 = jax.random.split(param_key, 4)
        C, D = in_channels, hidden
        w1 = 0.2 * jax.random.normal(k1, (C, D), dtype=jnp.float32)
        w2 = 0.2 * jax.random.normal(k2, (D, C), dtype=jnp.float32)
        # Layer 1 stays f32 (VPU path, tiny contraction); layer 2 is bf16 for the MXU.
        self.w1t = jnp.asarray(w1.T, dtype=jnp.float32)     # (D, C)
        self.w2t = jnp.asarray(w2.T, dtype=jnp.bfloat16)    # (C, D)
        self.t_emb = 0.1 * jax.random.normal(k3, (T, D), dtype=jnp.float32)
        # extra row = unconditional (y=None) embedding
        self.y_emb = 0.1 * jax.random.normal(k4, (num_class + 1, D), dtype=jnp.float32)

    def _embedding(self, t, y_idx):
        emb = self.t_emb[t] + self.y_emb[y_idx]             # (B, D) glue gathers
        return emb[:, :, None]                              # (B, D, 1)

    def __call__(self, x_0, y_0, key, augm=None):
        # `augm` is ignored by the stand-in model (the torch `model` is arbitrary).
        B, C, H, W = x_0.shape
        HW = H * W
        k_t, k_noise, k_drop, k_bal = jax.random.split(key, 4)

        t = jax.random.randint(k_t, (B,), 0, self.T)             # torch.randint(T, (B,))
        noise = jax.random.normal(k_noise, (B, C, HW), dtype=jnp.float32)

        # extract(v, t, x_shape) -> per-batch broadcast coefficients, kept as (B,1,1) f32.
        coef_a = self.sqrt_alphas_bar[t].reshape(B, 1, 1)
        coef_b = self.sqrt_one_minus_alphas_bar[t].reshape(B, 1, 1)

        x0_f = x_0.reshape(B, C, HW).astype(jnp.float32)         # flattened NCHW (free)

        y_idx = y_0.astype(jnp.int32)
        if self.cfg or self.cb:
            # Traced 10% label drop (replaces torch's host-side `torch.rand(1)[0] < 1/10`).
            drop = jax.random.uniform(k_drop, ()) < (1.0 / 10.0)
        else:
            drop = jnp.array(False)
        # Dropped label -> unconditional embedding row (index == num_class).
        y_cond = jnp.where(drop, jnp.int32(self.num_class), y_idx)
        emb_c = self._embedding(t, y_cond)                       # (B, D, 1)

        if self.cb:
            p = None if self.finetune else self.weight
            y_bal = jax.random.choice(k_bal, self.num_class, (B,), p=p).astype(jnp.int32)
            emb_b = self._embedding(t, y_bal)
            # weight = t/T*tau, zeroed when dropped (torch skips the cb branch entirely).
            wvec = jnp.where(drop, 0.0, t.astype(jnp.float32) / self.T * self.tau)
            wvec = wvec.reshape(B, 1, 1)
            loss_f, second_f = fused_cb_forward(
                x0_f, noise, coef_a, coef_b, wvec, emb_c, emb_b, self.w1t, self.w2t)
            loss = loss_f.reshape(B, C, H, W)
            second = second_f.reshape(B, C, H, W)
        else:
            loss_f = fused_mse_forward(
                x0_f, noise, coef_a, coef_b, emb_c, self.w1t, self.w2t)
            loss = loss_f.reshape(B, C, H, W)
            # torch: loss_reg = loss_com = tensor(0) -> loss_reg + 1/4*loss_com is scalar 0
            second = jnp.zeros((), jnp.float32)
        return loss, second


# ---------------------------------------------------------------------------
# Pure-JAX reference (matches kernel op-order; only MXU accumulation order differs)
# ---------------------------------------------------------------------------

def _ref_model(xt, emb, w1t, w2t):
    B, C, HW = xt.shape
    acc = w1t[None, :, 0:1] * xt[:, 0:1, :]
    for c in range(1, C):
        acc = acc + w1t[None, :, c:c + 1] * xt[:, c:c + 1, :]
    a = jnp.maximum(acc + emb, 0.0).astype(jnp.bfloat16).astype(jnp.float32)
    w2f = w2t.astype(jnp.float32)
    return (w2f[None, :, :, None] * a[:, None, :, :]).sum(axis=2)       # (B, C, HW)


def _ref_cb(x0, noise, coef_a, coef_b, wvec, emb_c, emb_b, w1t, w2t):
    xt = coef_a * x0 + coef_b * noise
    h = _ref_model(xt, emb_c, w1t, w2t)
    h_bal = _ref_model(xt, emb_b, w1t, w2t)
    loss = (h - noise) ** 2
    second = 1.25 * wvec * (h - h_bal) ** 2
    return loss, second


# ---------------------------------------------------------------------------
# Demo
# ---------------------------------------------------------------------------

if __name__ == "__main__":
    key = jax.random.PRNGKey(0)
    k_x, k_y, k_param, k_fwd = jax.random.split(key, 4)

    B, C, H, W = 2, 4, 16, 16
    T, num_class, hidden = 16, 4, 32
    HW = H * W

    x_0 = jax.random.normal(k_x, (B, C, H, W), dtype=jnp.float32)
    y_0 = jax.random.randint(k_y, (B,), 0, num_class)
    weight = jnp.ones((num_class,), jnp.float32) / num_class

    trainer = GaussianDiffusionTrainer(
        k_param, beta_1=1e-4, beta_T=0.02, T=T, num_class=num_class,
        cfg=False, cb=True, tau=0.5, weight=weight, finetune=False,
        in_channels=C, hidden=hidden)

    # End-to-end jitted forward (label drop is traced now -> no host sync per step).
    fwd = jax.jit(lambda x, y, k: trainer(x, y, k))
    loss, second = fwd(x_0, y_0, k_fwd)
    jax.block_until_ready((loss, second))
    assert loss.shape == (B, C, H, W) and loss.dtype == jnp.float32
    assert second.shape == (B, C, H, W)
    assert bool(jnp.all(jnp.isfinite(loss))) and bool(jnp.all(jnp.isfinite(second)))

    # Direct kernel tests against the pure-JAX reference (independent of the random drop).
    t_demo = jnp.arange(B, dtype=jnp.int32) % T
    ca = trainer.sqrt_alphas_bar[t_demo].reshape(B, 1, 1)
    cbv = trainer.sqrt_one_minus_alphas_bar[t_demo].reshape(B, 1, 1)
    wv = (t_demo.astype(jnp.float32) / T * 0.5).reshape(B, 1, 1)
    x0_f = x_0.reshape(B, C, HW)
    nz_f = jax.random.normal(jax.random.PRNGKey(1), (B, C, HW), dtype=jnp.float32)
    y_bal_demo = (y_0 + 1) % num_class
    emb_c = trainer._embedding(t_demo, y_0.astype(jnp.int32))
    emb_b = trainer._embedding(t_demo, y_bal_demo.astype(jnp.int32))

    l_cb, s_cb = fused_cb_forward(x0_f, nz_f, ca, cbv, wv, emb_c, emb_b,
                                  trainer.w1t, trainer.w2t)
    l_mse = fused_mse_forward(x0_f, nz_f, ca, cbv, emb_c, trainer.w1t, trainer.w2t)
    jax.block_until_ready((l_cb, s_cb, l_mse))

    l_ref, s_ref = _ref_cb(x0_f, nz_f, ca, cbv, wv, emb_c, emb_b,
                           trainer.w1t, trainer.w2t)

    assert l_cb.shape == (B, C, HW) and l_mse.shape == (B, C, HW)
    assert bool(jnp.all(jnp.isfinite(l_cb)))
    assert bool(jnp.all(jnp.isfinite(s_cb)))
    assert bool(jnp.all(jnp.isfinite(l_mse)))
    # Kernel vs pure-JAX reference.
    assert bool(jnp.allclose(l_cb, l_ref, rtol=1e-3, atol=5e-3))
    assert bool(jnp.allclose(s_cb, s_ref, rtol=1e-3, atol=5e-3))
    # Same conditional inputs -> the MSE part of both kernels must agree.
    assert bool(jnp.allclose(l_cb, l_mse, rtol=1e-5, atol=1e-5))
    # Identical cond/balanced embeddings -> h == h_bal -> second term is exactly 0.
    _, s_zero = fused_cb_forward(x0_f, nz_f, ca, cbv, wv, emb_c, emb_c,
                                 trainer.w1t, trainer.w2t)
    jax.block_until_ready(s_zero)
    assert bool(jnp.allclose(s_zero, 0.0, atol=1e-6))

    print("KERNEL_OK")
</pallas_src>

<mosaic_0001>
module attributes {stable_mosaic.version = 11 : i64} {
  func.func @_fused_cb_kernel(%arg0: i32, %arg1: memref<1x4x256xf32, #tpu.memory_space<vmem>>, %arg2: memref<1x4x256xf32, #tpu.memory_space<vmem>>, %arg3: memref<1x1x1xf32, #tpu.memory_space<vmem>>, %arg4: memref<1x1x1xf32, #tpu.memory_space<vmem>>, %arg5: memref<1x1x1xf32, #tpu.memory_space<vmem>>, %arg6: memref<1x32x1xf32, #tpu.memory_space<vmem>>, %arg7: memref<1x32x1xf32, #tpu.memory_space<vmem>>, %arg8: memref<32x4xf32, #tpu.memory_space<vmem>>, %arg9: memref<4x32xbf16, #tpu.memory_space<vmem>>, %arg10: memref<1x4x256xf32, #tpu.memory_space<vmem>>, %arg11: memref<1x4x256xf32, #tpu.memory_space<vmem>>) attributes {dimension_semantics = [#tpu.dimension_semantics<parallel>], iteration_bounds = array<i64: 2>, scalar_prefetch = 0 : i64, scratch_operands = 0 : i64, tpu.core_type = #tpu.core_type<tc>, window_params = [{transform_indices = @transform_0, window_bounds = array<i64: 1, 4, 256>}, {transform_indices = @transform_1, window_bounds = array<i64: 1, 4, 256>}, {transform_indices = @transform_2, window_bounds = array<i64: 1, 1, 1>}, {transform_indices = @transform_3, window_bounds = array<i64: 1, 1, 1>}, {transform_indices = @transform_4, window_bounds = array<i64: 1, 1, 1>}, {transform_indices = @transform_5, window_bounds = array<i64: 1, 32, 1>}, {transform_indices = @transform_6, window_bounds = array<i64: 1, 32, 1>}, {pipeline_mode = #tpu.pipeline_mode<synchronous>, transform_indices = @transform_7, window_bounds = array<i64: 32, 4>}, {pipeline_mode = #tpu.pipeline_mode<synchronous>, transform_indices = @transform_8, window_bounds = array<i64: 4, 32>}, {transform_indices = @transform_9, window_bounds = array<i64: 1, 4, 256>}, {transform_indices = @transform_10, window_bounds = array<i64: 1, 4, 256>}]} {
    %c0 = arith.constant 0 : index
    %c0_0 = arith.constant 0 : index
    %0 = vector.load %arg8[%c0, %c0_0] : memref<32x4xf32, #tpu.memory_space<vmem>>, vector<32x4xf32>
    %c0_1 = arith.constant 0 : index
    %c0_2 = arith.constant 0 : index
    %1 = vector.load %arg9[%c0_1, %c0_2] : memref<4x32xbf16, #tpu.memory_space<vmem>>, vector<4x32xbf16>
    %c0_i32 = arith.constant 0 : i32
    %2 = arith.index_cast %c0_i32 : i32 to index
    %c0_3 = arith.constant 0 : index
    %c0_4 = arith.constant 0 : index
    %3 = vector.load %arg1[%2, %c0_3, %c0_4] : memref<1x4x256xf32, #tpu.memory_space<vmem>>, vector<1x4x256xf32>
    %4 = vector.shape_cast %3 : vector<1x4x256xf32> to vector<4x256xf32>
    %5 = arith.index_cast %c0_i32 : i32 to index
    %c0_5 = arith.constant 0 : index
    %c0_6 = arith.constant 0 : index
    %6 = vector.load %arg2[%5, %c0_5, %c0_6] : memref<1x4x256xf32, #tpu.memory_space<vmem>>, vector<1x4x256xf32>
    %7 = vector.shape_cast %6 : vector<1x4x256xf32> to vector<4x256xf32>
    %8 = arith.index_cast %c0_i32 : i32 to index
    %c0_7 = arith.constant 0 : index
    %c0_8 = arith.constant 0 : index
    %9 = vector.load %arg3[%8, %c0_7, %c0_8] : memref<1x1x1xf32, #tpu.memory_space<vmem>>, vector<1x1x1xf32>
    %10 = vector.shape_cast %9 : vector<1x1x1xf32> to vector<1x1xf32>
    %11 = vector.broadcast %10 : vector<1x1xf32> to vector<4x256xf32>
    %12 = arith.mulf %11, %4 : vector<4x256xf32>
    %13 = arith.index_cast %c0_i32 : i32 to index
    %c0_9 = arith.constant 0 : index
    %c0_10 = arith.constant 0 : index
    %14 = vector.load %arg4[%13, %c0_9, %c0_10] : memref<1x1x1xf32, #tpu.memory_space<vmem>>, vector<1x1x1xf32>
    %15 = vector.shape_cast %14 : vector<1x1x1xf32> to vector<1x1xf32>
    %16 = vector.broadcast %15 : vector<1x1xf32> to vector<4x256xf32>
    %17 = arith.mulf %16, %7 : vector<4x256xf32>
    %18 = arith.addf %12, %17 : vector<4x256xf32>
    %19 = vector.extract_strided_slice %0 {offsets = [0, 0], sizes = [32, 1], strides = [1, 1]} : vector<32x4xf32> to vector<32x1xf32>
    %20 = vector.extract_strided_slice %18 {offsets = [0, 0], sizes = [1, 256], strides = [1, 1]} : vector<4x256xf32> to vector<1x256xf32>
    %21 = vector.broadcast %19 : vector<32x1xf32> to vector<32x256xf32>
    %22 = vector.broadcast %20 : vector<1x256xf32> to vector<32x256xf32>
    %23 = arith.mulf %21, %22 : vector<32x256xf32>
    %24 = vector.extract_strided_slice %0 {offsets = [0, 1], sizes = [32, 1], strides = [1, 1]} : vector<32x4xf32> to vector<32x1xf32>
    %25 = vector.extract_strided_slice %18 {offsets = [1, 0], sizes = [1, 256], strides = [1, 1]} : vector<4x256xf32> to vector<1x256xf32>
    %26 = vector.broadcast %24 : vector<32x1xf32> to vector<32x256xf32>
    %27 = vector.broadcast %25 : vector<1x256xf32> to vector<32x256xf32>
    %28 = arith.mulf %26, %27 : vector<32x256xf32>
    %29 = arith.addf %23, %28 : vector<32x256xf32>
    %30 = vector.extract_strided_slice %0 {offsets = [0, 2], sizes = [32, 1], strides = [1, 1]} : vector<32x4xf32> to vector<32x1xf32>
    %31 = vector.extract_strided_slice %18 {offsets = [2, 0], sizes = [1, 256], strides = [1, 1]} : vector<4x256xf32> to vector<1x256xf32>
    %32 = vector.broadcast %30 : vector<32x1xf32> to vector<32x256xf32>
    %33 = vector.broadcast %31 : vector<1x256xf32> to vector<32x256xf32>
    %34 = arith.mulf %32, %33 : vector<32x256xf32>
    %35 = arith.addf %29, %34 : vector<32x256xf32>
    %36 = vector.extract_strided_slice %0 {offsets = [0, 3], sizes = [32, 1], strides = [1, 1]} : vector<32x4xf32> to vector<32x1xf32>
    %37 = vector.extract_strided_slice %18 {offsets = [3, 0], sizes = [1, 256], strides = [1, 1]} : vector<4x256xf32> to vector<1x256xf32>
    %38 = vector.broadcast %36 : vector<32x1xf32> to vector<32x256xf32>
    %39 = vector.broadcast %37 : vector<1x256xf32> to vector<32x256xf32>
    %40 = arith.mulf %38, %39 : vector<32x256xf32>
    %41 = arith.addf %35, %40 : vector<32x256xf32>
    %42 = arith.index_cast %c0_i32 : i32 to index
    %c0_11 = arith.constant 0 : index
    %c0_12 = arith.constant 0 : index
    %43 = vector.load %arg6[%42, %c0_11, %c0_12] : memref<1x32x1xf32, #tpu.memory_space<vmem>>, vector<1x32x1xf32>
    %44 = vector.shape_cast %43 : vector<1x32x1xf32> to vector<32x1xf32>
    %45 = vector.broadcast %44 : vector<32x1xf32> to vector<32x256xf32>
    %46 = arith.addf %41, %45 : vector<32x256xf32>
    %cst = arith.constant 0.000000e+00 : f32
    %47 = vector.broadcast %cst : f32 to vector<32x256xf32>
    %48 = arith.maximumf %46, %47 : vector<32x256xf32>
    %49 = arith.truncf %48 : vector<32x256xf32> to vector<32x256xbf16>
    %50 = arith.index_cast %c0_i32 : i32 to index
    %c0_13 = arith.constant 0 : index
    %c0_14 = arith.constant 0 : index
    %51 = vector.load %arg7[%50, %c0_13, %c0_14] : memref<1x32x1xf32, #tpu.memory_space<vmem>>, vector<1x32x1xf32>
    %52 = vector.shape_cast %51 : vector<1x32x1xf32> to vector<32x1xf32>
    %53 = vector.broadcast %52 : vector<32x1xf32> to vector<32x256xf32>
    %54 = arith.addf %41, %53 : vector<32x256xf32>
    %cst_15 = arith.constant 0.000000e+00 : f32
    %55 = vector.broadcast %cst_15 : f32 to vector<32x256xf32>
    %56 = arith.maximumf %54, %55 : vector<32x256xf32>
    %57 = arith.truncf %56 : vector<32x256xf32> to vector<32x256xbf16>
    %58 = tpu.concatenate %49, %57 in 1 : vector<32x256xbf16>, vector<32x256xbf16> -> vector<32x512xbf16>
    %cst_16 = arith.constant dense<0.000000e+00> : vector<4x512xf32>
    %59 = tpu.matmul %1, %58, %cst_16 {dimension_numbers = #tpu.dot_dimension_numbers<[1], [0], [0], [1], [0, 0, 1, 1], [], []>} : vector<4x32xbf16>, vector<32x512xbf16>, vector<4x512xf32> -> vector<4x512xf32>
    %60 = vector.extract_strided_slice %59 {offsets = [0, 0], sizes = [4, 256], strides = [1, 1]} : vector<4x512xf32> to vector<4x256xf32>
    %61 = vector.extract_strided_slice %59 {offsets = [0, 256], sizes = [4, 256], strides = [1, 1]} : vector<4x512xf32> to vector<4x256xf32>
    %62 = arith.subf %60, %7 : vector<4x256xf32>
    %63 = arith.mulf %62, %62 : vector<4x256xf32>
    %64 = arith.index_cast %c0_i32 : i32 to index
    %c0_17 = arith.constant 0 : index
    %c0_18 = arith.constant 0 : index
    %65 = vector.load %arg10[%64, %c0_17, %c0_18] : memref<1x4x256xf32, #tpu.memory_space<vmem>>, vector<1x4x256xf32>
    %66 = vector.shape_cast %65 : vector<1x4x256xf32> to vector<4x256xf32>
    %67 = vector.shape_cast %63 : vector<4x256xf32> to vector<1x4x256xf32>
    tpu.vector_store %arg10[%64, %c0_17, %c0_18], %67 {strides = array<i32>} : memref<1x4x256xf32, #tpu.memory_space<vmem>>, vector<1x4x256xf32>,
    %68 = arith.subf %60, %61 : vector<4x256xf32>
    %69 = arith.index_cast %c0_i32 : i32 to index
    %c0_19 = arith.constant 0 : index
    %c0_20 = arith.constant 0 : index
    %70 = vector.load %arg5[%69, %c0_19, %c0_20] : memref<1x1x1xf32, #tpu.memory_space<vmem>>, vector<1x1x1xf32>
    %71 = vector.shape_cast %70 : vector<1x1x1xf32> to vector<1x1xf32>
    %cst_21 = arith.constant 1.250000e+00 : f32
    %72 = vector.broadcast %cst_21 : f32 to vector<1x1xf32>
    %73 = arith.mulf %72, %71 : vector<1x1xf32>
    %74 = arith.mulf %68, %68 : vector<4x256xf32>
    %75 = vector.broadcast %73 : vector<1x1xf32> to vector<4x256xf32>
    %76 = arith.mulf %75, %74 : vector<4x256xf32>
    %77 = arith.index_cast %c0_i32 : i32 to index
    %c0_22 = arith.constant 0 : index
    %c0_23 = arith.constant 0 : index
    %78 = vector.load %arg11[%77, %c0_22, %c0_23] : memref<1x4x256xf32, #tpu.memory_space<vmem>>, vector<1x4x256xf32>
    %79 = vector.shape_cast %78 : vector<1x4x256xf32> to vector<4x256xf32>
    %80 = vector.shape_cast %76 : vector<4x256xf32> to vector<1x4x256xf32>
    tpu.vector_store %arg11[%77, %c0_22, %c0_23], %80 {strides = array<i32>} : memref<1x4x256xf32, #tpu.memory_space<vmem>>, vector<1x4x256xf32>,
    %c1_i32 = arith.constant 1 : i32
    return
  }
  func.func @transform_0(%arg0: i32) -> (i32, i32, i32) {
    %c0_i32 = arith.constant 0 : i32
    %c0_i32_0 = arith.constant 0 : i32
    %c0_i32_1 = arith.constant 0 : i32
    return %arg0, %c0_i32, %c0_i32_0 : i32, i32, i32
  }
  func.func @transform_1(%arg0: i32) -> (i32, i32, i32) {
    %c0_i32 = arith.constant 0 : i32
    %c0_i32_0 = arith.constant 0 : i32
    %c0_i32_1 = arith.constant 0 : i32
    return %arg0, %c0_i32, %c0_i32_0 : i32, i32, i32
  }
  func.func @transform_2(%arg0: i32) -> (i32, i32, i32) {
    %c0_i32 = arith.constant 0 : i32
    %c0_i32_0 = arith.constant 0 : i32
    %c0_i32_1 = arith.constant 0 : i32
    return %arg0, %c0_i32, %c0_i32_0 : i32, i32, i32
  }
  func.func @transform_3(%arg0: i32) -> (i32, i32, i32) {
    %c0_i32 = arith.constant 0 : i32
    %c0_i32_0 = arith.constant 0 : i32
    %c0_i32_1 = arith.constant 0 : i32
    return %arg0, %c0_i32, %c0_i32_0 : i32, i32, i32
  }
  func.func @transform_4(%arg0: i32) -> (i32, i32, i32) {
    %c0_i32 = arith.constant 0 : i32
    %c0_i32_0 = arith.constant 0 : i32
    %c0_i32_1 = arith.constant 0 : i32
    return %arg0, %c0_i32, %c0_i32_0 : i32, i32, i32
  }
  func.func @transform_5(%arg0: i32) -> (i32, i32, i32) {
    %c0_i32 = arith.constant 0 : i32
    %c0_i32_0 = arith.constant 0 : i32
    %c0_i32_1 = arith.constant 0 : i32
    return %arg0, %c0_i32, %c0_i32_0 : i32, i32, i32
  }
  func.func @transform_6(%arg0: i32) -> (i32, i32, i32) {
    %c0_i32 = arith.constant 0 : i32
    %c0_i32_0 = arith.constant 0 : i32
    %c0_i32_1 = arith.constant 0 : i32
    return %arg0, %c0_i32, %c0_i32_0 : i32, i32, i32
  }
  func.func @transform_7(%arg0: i32) -> (i32, i32) {
    %c0_i32 = arith.constant 0 : i32
    %c0_i32_0 = arith.constant 0 : i32
    %c0_i32_1 = arith.constant 0 : i32
    return %c0_i32, %c0_i32_0 : i32, i32
  }
  func.func @transform_8(%arg0: i32) -> (i32, i32) {
    %c0_i32 = arith.constant 0 : i32
    %c0_i32_0 = arith.constant 0 : i32
    %c0_i32_1 = arith.constant 0 : i32
    return %c0_i32, %c0_i32_0 : i32, i32
  }
  func.func @transform_9(%arg0: i32) -> (i32, i32, i32) {
    %c0_i32 = arith.constant 0 : i32
    %c0_i32_0 = arith.constant 0 : i32
    %c0_i32_1 = arith.constant 0 : i32
    return %arg0, %c0_i32, %c0_i32_0 : i32, i32, i32
  }
  func.func @transform_10(%arg0: i32) -> (i32, i32, i32) {
    %c0_i32 = arith.constant 0 : i32
    %c0_i32_0 = arith.constant 0 : i32
    %c0_i32_1 = arith.constant 0 : i32
    return %arg0, %c0_i32, %c0_i32_0 : i32, i32, i32
  }
}

</mosaic_0001>

<bundles_post_ra>
// kernel: custom-call.1
= control target key start
LH: loop header
LB: loop body
LE: loop exit
PB: predicated region body
PF: predicated region fallthrough
CT: control target
= control target key end

     0   :  { %s6_s0 = inlined_call_operand.vmem [shape: u32[2], index: 0, kind: output, shape index: {}]  }

// kernel: _lambda_.1
= control target key start
LH: loop header
LB: loop body
LE: loop exit
PB: predicated region body
PF: predicated region fallthrough
CT: control target
= control target key end

     0   :  { %s1185_s13 = smov 0   ;;  %s1277_s0 = inlined_call_operand.vmem [shape: f32[2,4,256], index: 0, kind: input, shape index: {}]   ;;  %s1278_s1 = inlined_call_operand.vmem [shape: f32[2,4,256], index: 1, kind: input, shape index: {}]   ;;  %s1279_s2 = inlined_call_operand.vmem [shape: f32[2,1,1], index: 2, kind: input, shape index: {}]   ;;  %s1280_s3 = inlined_call_operand.vmem [shape: f32[2,1,1], index: 3, kind: input, shape index: {}]   ;;  %s1281_s4 = inlined_call_operand.vmem [shape: f32[2,1,1], index: 4, kind: input, shape index: {}]   ;;  %s1282_s5 = inlined_call_operand.vmem [shape: f32[2,32,1], index: 5, kind: input, shape index: {}]   ;;  %s1283_s6 = inlined_call_operand.vmem [shape: f32[2,32,1], index: 6, kind: input, shape index: {}]   ;;  %s1284_s7 = inlined_call_operand.vmem [shape: f32[32,4], index: 7, kind: input, shape index: {}]   ;;  %s1285_s8 = inlined_call_operand.vmem [shape: bf16[4,32], index: 8, kind: input, shape index: {}]   ;;  %s1286_s9 = inlined_call_operand.vmem [shape: f32[2,4,256], index: 9, kind: output, shape index: {0}]   ;;  %s1287_s10 = inlined_call_operand.vmem [shape: f32[2,4,256], index: 10, kind: output, shape index: {1}]  }
   0x1 LB: > { %s1062_s14 = sadd.s32 4294967295, %s1124_s13   ;;  %p1066_p0 = scmp.ge.s32.totalorder %s1124_s13, 1  ;;  %s1124_s13 = sphi %s1185_s13, %s21_s13  }
   0x2   : > { %p369_p1 = scmp.lt.s32.totalorder %s1124_s13, 3 }
   0x4   : > { %p370_p2 = pnand %p1066_p0, %p369_p1 }
   0x5   : > { %v476_v0 = vld [vmem:[%s1284_s7] sm:$0xff] (!%p370_p2)  ;;  %p436_p3 = scmp.lt.s32.totalorder (!%p370_p2), %s1062_s14, 1  ;;  %v1126_v1 = vmov (!%p370_p2), 0   ;;  %v477_v2 = vld [vmem:[%s1284_s7 + $0x8] sm:$0xff] (!%p370_p2)  ;;  %v1127_v5 = vmov (!%p370_p2), 1   ;;  %v1128_v6 = vmov (!%p370_p2), 2   ;;  %v527_v15 = vlaneseq (!%p370_p2) }
   0x6   : > { %373 = sbr.rel (%p370_p2) target bundleno = 431 (0x1af), region = 56  ;;  %1103 = vset.pattern.permute.xlu1 (!%p370_p2), %v1126_v1  ;;  %1106 = vset.pattern.permute.xlu0 (!%p370_p2), %v1126_v1  ;;  %v478_v7 = vld [vmem:[%s1284_s7 + $0x10] sm:$0xff] (!%p370_p2)  ;;  %v479_v8 = vld [vmem:[%s1284_s7 + $0x18] sm:$0xff] (!%p370_p2)  ;;  %v1129_v9 = vmov (!%p370_p2), 3   ;;  %vm791_vm0 = vcmask (!%p370_p2), 261120  }
   0x7   : > { %508 = vperm.xlu1 (!%p370_p2), %1103, %v476_v0   ;;  %827 = vmatprep.mubr.bf16.mxu0 (!%p370_p2), %v1126_v1  ;;  %v528_v17 = vshrl.u32 (!%p370_p2), %v527_v15, 7 }
   0x8   : > { %868 = vmatprep.mubr.bf16.mxu1 (!%p370_p2), %v1126_v1 }
   0x9   : > { %v529_v20 = vsub.s32 (!%p370_p2), 0, %v528_v17  ;;  %v533_v39 = vsub.s32 (!%p370_p2), 4, %v528_v17  ;;  %v571_v40 = vsub.s32 (!%p370_p2), 1, %v528_v17  ;;  %v575_v41 = vsub.s32 (!%p370_p2), 5, %v528_v17 }
   0xa   : > { %v621_v43 = vsub.s32 (!%p370_p2), 2, %v528_v17  ;;  %v625_v44 = vsub.s32 (!%p370_p2), 6, %v528_v17  ;;  %v671_v50 = vsub.s32 (!%p370_p2), 3, %v528_v17  ;;  %v675_v51 = vsub.s32 (!%p370_p2), 7, %v528_v17 }
   0xb   : > { %513 = vperm.xlu1 (!%p370_p2), %1103, %v477_v2  }
   0xd   : > { %s1289_s14 = smov (!%p436_p3, %s1062_s14), 1 }
   0xe   : > { %s448_s21 = scalar_lea.vmem %s1279_s2, %s1289_s14  ;;  %s451_s24 = scalar_lea.vmem %s1280_s3, %s1289_s14 }
   0xf   : > { %v1079_v3 = vld [vmem:[%s448_s21] ss:$0 sm:$0xff]  ;;  %1104 = vset.pattern.permute.xlu1 %v1127_v5  ;;  %s1087_s29 = sshll.u32 %s1289_s14, 5  ;;  %s454_s20 = scalar_lea.vmem %s1281_s4, %s1289_s14 }
  0x10   : > { %490 = vperm.xlu0 %1106, %v1079_v3   ;;  %v1080_v4 = vld [vmem:[%s451_s24] ss:$0 sm:$0xff]  ;;  %558 = vperm.xlu1 %1104, %v477_v2   ;;  %s459_s12 = scalar_lea.vmem %s1282_s5, %s1087_s29  ;;  %s464_s17 = scalar_lea.vmem %s1283_s6, %s1087_s29 }
  0x11   : > { %v703_v10 = vld [vmem:[%s459_s12] sm:$0xff]  ;;  %v748_v11 = vld [vmem:[%s464_s17 + $0x8] sm:$0xff]  ;;  %v706_v12 = vld [vmem:[%s459_s12 + $0x18] sm:$0xff]  ;;  %s1227_s21 = sshll.u32 %s1289_s14, 3 }
  0x12   : > { %v750_v13 = vld [vmem:[%s464_s17 + $0x18] sm:$0xff]  ;;  %v704_v14 = vld [vmem:[%s459_s12 + $0x8] sm:$0xff]  ;;  %v747_v16 = vld [vmem:[%s464_s17] sm:$0xff]  ;;  %s440_s24 = scalar_lea.vmem %s1277_s0, %s1227_s21  ;;  %s445_s27 = scalar_lea.vmem %s1278_s1, %s1227_s21 }
  0x13   : > { %v705_v18 = vld [vmem:[%s459_s12 + $0x10] sm:$0xff]  ;;  %v891_v19 = vld [vmem:[%s454_s20] sm:$0x1]  ;;  %s469_s11 = scalar_lea.vmem %s1286_s9, %s1227_s21  ;;  %s474_s16 = scalar_lea.vmem %s1287_s10, %s1227_s21 }
  0x14   : > { %501 = vperm.xlu0 %1106, %v1080_v4   ;;  %1105 = vset.pattern.permute.xlu1 %v1128_v6  ;;  %v892_v21 = vmul.f32 1.25, %v891_v19  ;;  %v749_v22 = vld [vmem:[%s464_s17 + $0x10] sm:$0xff]  ;;  %v481_v31 = vld [vmem:[%s440_s24] sm:$0xff] }
  0x15   : > { %604 = vperm.xlu1 %1105, %v476_v0   ;;  %v1237_v32 = vld [vmem:[%s445_s27] sm:$0xff] }
  0x16   : > { %v899_v23 = vrot.slane %v892_v21, %v529_v20 }
  0x18   : > { %1107 = vset.pattern.permute.xlu0 %v1128_v6 }
  0x19   : > { %608 = vperm.xlu0 %1107, %v477_v2   ;;  %1109 = vset.pattern.permute.xlu1 %v1126_v1 }
  0x1a   : > { %518 = vperm.xlu1 %1109, %v478_v7  }
  0x1d   : > { %1108 = vset.pattern.permute.xlu0 %v1127_v5 }
  0x1e   : > { %554 = vperm.xlu0 %1108, %v476_v0   ;;  %523 = vperm.xlu1 %1109, %v479_v8  }
  0x22   : > { %562 = vperm.xlu0 %1108, %v478_v7   ;;  %1110 = vset.pattern.permute.xlu1 %v1127_v5 }
  0x23   : > { %566 = vperm.xlu1 %1110, %v479_v8  }
  0x26   : > { %1112 = vset.pattern.permute.xlu0 %v1129_v9 }
  0x27   : > { %658 = vperm.xlu0 %1112, %v477_v2   ;;  %1111 = vset.pattern.permute.xlu1 %v1129_v9 }
  0x28   : > { %654 = vperm.xlu1 %1111, %v476_v0  }
  0x2b   : > { %662 = vperm.xlu0 %1112, %v478_v7  }
  0x2c   : > { %1113 = vset.pattern.permute.xlu1 %v1128_v6 }
  0x2d   : > { %612 = vperm.xlu1 %1113, %v478_v7  }
  0x2f   : > { %1115 = vset.pattern.permute.xlu0 %v1126_v1 }
  0x30   : > { %709 = vperm.xlu0 %1115, %v703_v10  }
  0x31   : > { %616 = vperm.xlu1 %1113, %v479_v8  }
  0x34   : > { %758 = vperm.xlu0 %1115, %v748_v11  }
  0x35   : > { %1114 = vset.pattern.permute.xlu1 %v1129_v9 }
  0x36   : > { %666 = vperm.xlu1 %1114, %v479_v8  }
  0x38   : > { %724 = vperm.xlu0 %1115, %v706_v12  }
  0x3a   : > { %1116 = vset.pattern.permute.xlu1 %v1126_v1 }
  0x3b   : > { %714 = vperm.xlu1 %1116, %v704_v14  }
  0x3c   : > { %768 = vperm.xlu0 %1115, %v750_v13  }
  0x3f   : > { %753 = vperm.xlu1 %1116, %v747_v16  }
  0x43   : > { %719 = vperm.xlu1 %1116, %v705_v18  }
  0x47   : > { %763 = vperm.xlu1 %1116, %v749_v22  }
  0x4b   : > { %901 = vperm.xlu1 %1116, %v899_v23  }
  0x86   : > { %v509_v24 = vpop.permute.xlu1 %508 }
  0x8a   : > { %v514_v25 = vpop.permute.xlu1 %513 }
  0x8f   : > { %v491_v26 = vpop.permute.xlu0 %490  ;;  %v559_v28 = vpop.permute.xlu1 %558 }
  0x90   : > { %v493_v35 = vmul.f32 %v491_v26, %v481_v31 }
  0x93   : > { %v502_v27 = vpop.permute.xlu0 %501 }
  0x94   : > { %v605_v30 = vpop.permute.xlu1 %604  ;;  %v504_v36 = vmul.f32 %v502_v27, %v1237_v32 }
  0x96   : > { %v505_v38 = vadd.f32 %v504_v36, %v493_v35 }
  0x98   : > { %v609_v29 = vpop.permute.xlu0 %608  ;;  %v530_v45 = vrot.slane %v505_v38, %v529_v20  ;;  %v534_v46 = vrot.slane %v505_v38, %v533_v39  ;;  %v572_v47 = vrot.slane %v505_v38, %v571_v40  ;;  %v576_v48 = vrot.slane %v505_v38, %v575_v41 }
  0x99   : > { %v519_v34 = vpop.permute.xlu1 %518  ;;  %v622_v52 = vrot.slane %v505_v38, %v621_v43  ;;  %v626_v53 = vrot.slane %v505_v38, %v625_v44  ;;  %v672_v62 = vrot.slane %v505_v38, %v671_v50  ;;  %v676_v63 = vrot.slane %v505_v38, %v675_v51 }
  0x9a   : > { %v540_v55 = vrot.slane %v530_v45, %v529_v20  ;;  %v544_v56 = vrot.slane %v534_v46, %v529_v20  ;;  %v582_v57 = vrot.slane %v572_v47, %v571_v40  ;;  %v586_v58 = vrot.slane %v576_v48, %v571_v40 }
  0x9b   : > { %v632_v0 = vrot.slane %v622_v52, %v621_v43  ;;  %v636_v1 = vrot.slane %v626_v53, %v621_v43  ;;  %v1244_v7 = vrot.slane %v672_v62, %v671_v50  ;;  %v1246_v8 = vrot.slane %v676_v63, %v671_v50 }
  0x9c   : > { %v545_v2 = vmul.f32 %v540_v55, %v509_v24  ;;  %v546_v3 = vmul.f32 %v544_v56, %v509_v24  ;;  %v547_v10 = vmul.f32 %v540_v55, %v514_v25  ;;  %v548_v11 = vmul.f32 %v544_v56, %v514_v25 }
  0x9d   : > { %v555_v33 = vpop.permute.xlu0 %554  ;;  %v1240_v37 = vpop.permute.xlu1 %523  ;;  %v589_v12 = vmul.f32 %v582_v57, %v559_v28  ;;  %v590_v13 = vmul.f32 %v586_v58, %v559_v28  ;;  %v637_v14 = vmul.f32 %v632_v0, %v605_v30  ;;  %v638_v15 = vmul.f32 %v636_v1, %v605_v30 }
  0x9e   : > { %v587_v60 = vmul.f32 %v582_v57, %v555_v33  ;;  %v588_v61 = vmul.f32 %v586_v58, %v555_v33  ;;  %v639_v23 = vmul.f32 %v632_v0, %v609_v29  ;;  %v640_v24 = vmul.f32 %v636_v1, %v609_v29 }
  0x9f   : > { %v597_v21 = vadd.f32 %v589_v12, %v547_v10  ;;  %v598_v22 = vadd.f32 %v590_v13, %v548_v11  ;;  %v549_v33 = vmul.f32 %v540_v55, %v519_v34  ;;  %v550_v25 = vmul.f32 %v544_v56, %v519_v34 }
  0xa0   : > { %v595_v5 = vadd.f32 %v587_v60, %v545_v2  ;;  %v596_v6 = vadd.f32 %v588_v61, %v546_v3  ;;  %v551_v29 = vmul.f32 %v540_v55, %v1240_v37  ;;  %v552_v46 = vmul.f32 %v544_v56, %v1240_v37 }
  0xa1   : > { %v563_v42 = vpop.permute.xlu0 %562  ;;  %v647_v35 = vadd.f32 %v639_v23, %v597_v21  ;;  %v648_v36 = vadd.f32 %v640_v24, %v598_v22 }
  0xa2   : > { %v567_v49 = vpop.permute.xlu1 %566  ;;  %v645_v18 = vadd.f32 %v637_v14, %v595_v5  ;;  %v646_v19 = vadd.f32 %v638_v15, %v596_v6  ;;  %v591_v41 = vmul.f32 %v582_v57, %v563_v42  ;;  %v592_v43 = vmul.f32 %v586_v58, %v563_v42 }
  0xa3   : > { %v593_v38 = vmul.f32 %v582_v57, %v567_v49  ;;  %v594_v39 = vmul.f32 %v586_v58, %v567_v49 }
  0xa4   : > { %v599_v42 = vadd.f32 %v591_v41, %v549_v33  ;;  %v600_v58 = vadd.f32 %v592_v43, %v550_v25 }
  0xa6   : > { %v659_v54 = vpop.permute.xlu0 %658 }
  0xa7   : > { %v655_v59 = vpop.permute.xlu1 %654  ;;  %v689_v28 = vmul.f32 %v1244_v7, %v659_v54  ;;  %v690_v30 = vmul.f32 %v1246_v8, %v659_v54  ;;  %v601_v54 = vadd.f32 %v593_v38, %v551_v29 }
  0xa8   : > { %v687_v16 = vmul.f32 %v1244_v7, %v655_v59  ;;  %v688_v17 = vmul.f32 %v1246_v8, %v655_v59  ;;  %v602_v59 = vadd.f32 %v594_v39, %v552_v46 }
  0xa9   : > { %v697_v52 = vadd.f32 %v689_v28, %v647_v35  ;;  %v698_v53 = vadd.f32 %v690_v30, %v648_v36 }
  0xaa   : > { %v1242_v4 = vpop.permute.xlu0 %662  ;;  %v695_v27 = vadd.f32 %v687_v16, %v645_v18  ;;  %v696_v31 = vadd.f32 %v688_v17, %v646_v19 }
  0xab   : > { %v691_v12 = vmul.f32 %v1244_v7, %v1242_v4  ;;  %v692_v13 = vmul.f32 %v1246_v8, %v1242_v4 }
  0xac   : > { %v613_v9 = vpop.permute.xlu1 %612 }
  0xad   : > { %v641_v50 = vmul.f32 %v632_v0, %v613_v9  ;;  %v642_v51 = vmul.f32 %v636_v1, %v613_v9 }
  0xaf   : > { %v710_v26 = vpop.permute.xlu0 %709 }
  0xb0   : > { %v617_v20 = vpop.permute.xlu1 %616  ;;  %v727_v44 = vadd.f32 %v710_v26, %v695_v27  ;;  %v728_v45 = vadd.f32 %v710_v26, %v696_v31 }
  0xb1   : > { %v643_v48 = vmul.f32 %v632_v0, %v617_v20  ;;  %v644_v34 = vmul.f32 %v636_v1, %v617_v20  ;;  %v649_v0 = vadd.f32 %v641_v50, %v599_v42  ;;  %v650_v1 = vadd.f32 %v642_v51, %v600_v58 }
  0xb2   : > { %v735_v60 = vmax.f32 %v727_v44, 0.0  ;;  %v736_v55 = vmax.f32 %v728_v45, 0.0 }
  0xb3   : > { %v759_v47 = vpop.permute.xlu0 %758  ;;  %v651_v62 = vadd.f32 %v643_v48, %v601_v54  ;;  %v652_v37 = vadd.f32 %v644_v34, %v602_v59  ;;  %v699_v20 = vadd.f32 %v691_v12, %v649_v0  ;;  %v700_v21 = vadd.f32 %v692_v13, %v650_v1  ;;  %v480_v34 = vld [vmem:[%s1285_s8] sm:$0x3] }
  0xb4   : > { %v773_v3 = vadd.f32 %v759_v47, %v697_v52  ;;  %v774_v5 = vadd.f32 %v759_v47, %v698_v53 }
  0xb5   : > { %v667_v40 = vpop.permute.xlu1 %666 }
  0xb6   : > { %v693_v49 = vmul.f32 %v1244_v7, %v667_v40  ;;  %v694_v57 = vmul.f32 %v1246_v8, %v667_v40  ;;  %v781_v19 = vmax.f32 %v773_v3, 0.0  ;;  %v782_v22 = vmax.f32 %v774_v5, 0.0 }
  0xb7   : > { %v725_v56 = vpop.permute.xlu0 %724 }
  0xb8   : > { %v701_v6 = vadd.f32 %v693_v49, %v651_v62  ;;  %v702_v9 = vadd.f32 %v694_v57, %v652_v37 }
  0xba   : > { %v715_v61 = vpop.permute.xlu1 %714  ;;  %v733_v23 = vadd.f32 %v725_v56, %v701_v6  ;;  %v734_v24 = vadd.f32 %v725_v56, %v702_v9 }
  0xbb   : > { %v729_v63 = vadd.f32 %v715_v61, %v697_v52  ;;  %v730_v2 = vadd.f32 %v715_v61, %v698_v53  ;;  %v769_v26 = vpop.permute.xlu0 %768  ;;  %v878_v52 = vcombine.high %v1237_v32, %v1237_v32 }
  0xbc   : > { %v741_v35 = vmax.f32 %v733_v23, 0.0  ;;  %v742_v36 = vmax.f32 %v734_v24, 0.0 }
  0xbd   : > { %v737_v10 = vmax.f32 %v729_v63, 0.0  ;;  %v738_v11 = vmax.f32 %v730_v2, 0.0 }
  0xbe   : > { %v754_v14 = vpop.permute.xlu1 %753 }
  0xbf   : > { %v771_v15 = vadd.f32 %v754_v14, %v695_v27  ;;  %v772_v16 = vadd.f32 %v754_v14, %v696_v31  ;;  %v744_v17 = vpack.c.bf16 %v738_v11, %v736_v55  ;;  %v743_v18 = vpack.c.bf16 %v737_v10, %v735_v60 }
  0xc0   : > { %v777_v27 = vadd.f32 %v769_v26, %v701_v6  ;;  %v778_v31 = vadd.f32 %v769_v26, %v702_v9 }
  0xc1   : > { %v779_v33 = vmax.f32 %v771_v15, 0.0  ;;  %795 = vmatprep.subr.bf16.mxu0 %v744_v17  ;;  %v780_v25 = vmax.f32 %v772_v16, 0.0 }
  0xc2   : > { %v720_v28 = vpop.permute.xlu1 %719  ;;  %796 = vmatpush1.bf16.msra.mxu0 %v743_v18  ;;  %v785_v29 = vmax.f32 %v777_v27, 0.0  ;;  %v786_v46 = vmax.f32 %v778_v31, 0.0 }
  0xc3   : > { %v731_v7 = vadd.f32 %v720_v28, %v699_v20  ;;  %v732_v30 = vadd.f32 %v720_v28, %v700_v21  ;;  %v788_v4 = vpack.c.bf16 %v782_v22, %v780_v25  ;;  %v787_v8 = vpack.c.bf16 %v781_v19, %v779_v33 }
  0xc5   : > { %v739_v38 = vmax.f32 %v731_v7, 0.0  ;;  %v740_v39 = vmax.f32 %v732_v30, 0.0  ;;  %836 = vmatprep.subr.bf16.mxu1 %v788_v4 }
  0xc6   : > { %v764_v40 = vpop.permute.xlu1 %763  ;;  %837 = vmatpush1.bf16.msra.mxu1 %v787_v8 }
  0xc7   : > { %v775_v41 = vadd.f32 %v764_v40, %v699_v20  ;;  %v776_v43 = vadd.f32 %v764_v40, %v700_v21  ;;  %v746_v44 = vpack.c.bf16 %v742_v36, %v740_v39  ;;  %v745_v45 = vpack.c.bf16 %v741_v35, %v739_v38 }
  0xc9   : > { %v783_v47 = vmax.f32 %v775_v41, 0.0  ;;  %v784_v48 = vmax.f32 %v776_v43, 0.0  ;;  %797 = vmatprep.subr.bf16.mxu0 %v746_v44 }
  0xca   : > { %798 = vmatpush1.bf16.msra.mxu0 %v745_v45 }
  0xcb   : > { %v790_v50 = vpack.c.bf16 %v786_v46, %v784_v48  ;;  %v789_v51 = vpack.c.bf16 %v785_v29, %v783_v47 }
  0xcd   : > { %838 = vmatprep.subr.bf16.mxu1 %v790_v50  ;;  %1081 = vmatmul.mubr.msk.bf16.vlgmr.msra.gmra.mrb[0].mxu0 %vm791_vm0, %v480_v34 }
  0xce   : > { %839 = vmatpush1.bf16.msra.mxu1 %v789_v51 }
  0xd1   : > { %1082 = vmatmul.mubr.msk.bf16.vlgmr.msra.gmra.mrb[0].mxu1 %vm791_vm0, %v480_v34 }
 0x1a0   : > { %v829_v53 = vpop.f32.mrb[0].mxu0 }
 0x1a1   : > { %v880_v54 = vsub.f32 %v829_v53, %v1237_v32  ;;  %v831_v59 = vpop.f32.mrb[1].mxu0  ;;  %v902_v32 = vpop.permute.xlu1 %901 }
 0x1a2   : > { %v881_v49 = vsub.f32 %v831_v59, %v878_v52  ;;  %v833_v57 = vpop.f32.mrb[2].mxu0 }
 0x1a3   : > { %v882_v42 = vmul.f32 %v880_v54, %v880_v54  ;;  %v834_v58 = vpop.f32.mrb[3].mxu0 }
 0x1a4   : > { %v883_v60 = vmul.f32 %v881_v49, %v881_v49  ;;  %v870_v61 = vpop.f32.mrb[0].mxu1 }
 0x1a5   : > { %v889_v55 = vsub.f32 %v829_v53, %v870_v61  ;;  %v872_v62 = vpop.f32.mrb[1].mxu1 }
 0x1a6   : > { %v886_v37 = vcombine.low %v882_v42, %v883_v60  ;;  %v890_v56 = vsub.f32 %v831_v59, %v872_v62  ;;  %v874_v63 = vpop.f32.mrb[2].mxu1 }
 0x1a7   : > { %v893_v2 = vmul.f32 %v889_v55, %v889_v55  ;;  %v875_v0 = vpop.f32.mrb[3].mxu1 }
 0x1a8   : > { %888 = vst [vmem:[%s469_s11] sm:$0xff] %v886_v37  ;;  %v894_v1 = vmul.f32 %v890_v56, %v890_v56 }
 0x1a9   : > { %v904_v3 = vmul.f32 %v902_v32, %v893_v2 }
 0x1aa   : > { %v905_v5 = vmul.f32 %v902_v32, %v894_v1 }
 0x1ac   : > { %v908_v6 = vcombine.low %v904_v3, %v905_v5 }
 0x1ae   : > { %910 = vst [vmem:[%s474_s16] sm:$0xff] %v908_v6 }
 0x1af PF: > { %s21_s13 = sadd.s32 1, %s1124_s13  }
 0x1b0   : > { %p18_p4 = scmp.ge.s32.totalorder %s21_s13, 4  }
 0x1b2   :  { %20 = sbr.rel (!%p18_p4) target bundleno = 1 (0x1), region = 116 }

</bundles_post_ra>
